<compile_context>
chip_gen: v7x
topology: tpu7x:2x2x1
jax: 0.10.0
libtpu: 0.0.40
codegen_flags: <defaults>
</compile_context>

<pallas_src>
import functools

import jax
import jax.numpy as jnp
from jax import lax
from jax.experimental import pallas as pl
from jax.experimental.pallas import tpu as pltpu

BN_EPS = 1e-5


# ---------------------------------------------------------------------------
# Parameter packing
# ---------------------------------------------------------------------------
def _pack_params(params):
    """Pack (b, g, beta) of each hidden layer into one (3, N) array."""
    ws, bgbs = [], []
    for (w, b, g, beta) in params["hidden"]:
        ws.append(jnp.asarray(w, jnp.float32))
        bgbs.append(jnp.concatenate(
            [jnp.asarray(b, jnp.float32),
             jnp.asarray(g, jnp.float32),
             jnp.asarray(beta, jnp.float32)], axis=0))
    w_out, b_out = params["out"]
    return ws, bgbs, jnp.asarray(w_out, jnp.float32), jnp.asarray(b_out, jnp.float32)


# ---------------------------------------------------------------------------
# Path 1: small batch -> single fused kernel (whole net, whole batch in VMEM)
# ---------------------------------------------------------------------------
def _ann_fused_kernel(x_ref, *refs):
    """refs = (w1, bgb1, ..., wL, bgbL, w_out, b_out, o_ref)."""
    o_ref = refs[-1]
    param_refs = refs[:-1]
    n_hidden = (len(param_refs) - 2) // 2

    inv_n = jnp.float32(1.0 / x_ref.shape[0])
    h = x_ref[...]
    for li in range(n_hidden):
        w_ref, bgb_ref = param_refs[2 * li], param_refs[2 * li + 1]
        bgb = bgb_ref[...]
        b, g, beta = bgb[0:1, :], bgb[1:2, :], bgb[2:3, :]

        z = jnp.dot(h, w_ref[...], preferred_element_type=jnp.float32) + b
        # BatchNorm1d (training-mode batch stats): one-pass sum / sum-of-squares,
        # folded into a single scale/shift FMA.
        s = jnp.sum(z, axis=0, keepdims=True)
        ss = jnp.sum(z * z, axis=0, keepdims=True)
        mean = s * inv_n
        var = ss * inv_n - mean * mean
        scale = g * lax.rsqrt(var + BN_EPS)
        shift = beta - mean * scale
        # Dropout(p=0.0) == identity; activation == sigmoid.
        h = jax.nn.sigmoid(z * scale + shift)

    w_out_ref, b_out_ref = param_refs[-2], param_refs[-1]
    y = jnp.dot(h, w_out_ref[...], preferred_element_type=jnp.float32) + b_out_ref[...]
    o_ref[...] = jnp.tanh(y)


def _fused_cost(B, ws, w_out):
    flops, trans = 0, 0
    byts = B * ws[0].shape[0] * 4 + B * w_out.shape[1] * 4
    for w in ws:
        flops += 2 * B * w.shape[0] * w.shape[1] + 10 * B * w.shape[1]
        trans += B * w.shape[1]
        byts += (w.shape[0] * w.shape[1] + 3 * w.shape[1]) * 4
    flops += 2 * B * w_out.shape[0] * w_out.shape[1] + 2 * B * w_out.shape[1]
    trans += B * w_out.shape[1]
    byts += (w_out.shape[0] * w_out.shape[1] + w_out.shape[1]) * 4
    return pl.CostEstimate(flops=int(flops), transcendentals=int(trans),
                           bytes_accessed=int(byts))


def _ann_forward_fused(x, packed):
    ws, bgbs, w_out, b_out = packed
    flat = []
    for w, bgb in zip(ws, bgbs):
        flat.extend([w, bgb])
    flat.extend([w_out, b_out])

    B = x.shape[0]
    out_dim = w_out.shape[1]
    n_in = 1 + len(flat)

    return pl.pallas_call(
        _ann_fused_kernel,
        out_shape=jax.ShapeDtypeStruct((B, out_dim), jnp.float32),
        in_specs=[pl.BlockSpec(memory_space=pltpu.MemorySpace.VMEM)] * n_in,
        out_specs=pl.BlockSpec(memory_space=pltpu.MemorySpace.VMEM),
        cost_estimate=_fused_cost(B, ws, w_out),
    )(x, *flat)


# ---------------------------------------------------------------------------
# Path 2: large batch -> per-layer batch-tiled kernels, two-pass BatchNorm
# ---------------------------------------------------------------------------
def _bn_layer_kernel(x_ref, w_ref, bgb_ref, o_ref,
                     sum_ref, ssq_ref, scale_ref, shift_ref,
                     *, batch, tb, needs_mask):
    """Linear + BatchNorm1d(train) + sigmoid for one layer.

    Grid = (2, num_batch_tiles):
      pass 0: accumulate full-batch sum / sum-of-squares of z into VMEM scratch.
      pass 1: finalize fused scale/shift once, then normalize + activate tiles.
    """
    p = pl.program_id(0)
    t = pl.program_id(1)

    bgb = bgb_ref[...]                       # (3, N): [bias; gamma; beta]
    z = (jnp.dot(x_ref[...], w_ref[...], preferred_element_type=jnp.float32)
         + bgb[0:1, :])

    @pl.when(jnp.logical_and(p == 0, t == 0))
    def _init():
        sum_ref[...] = jnp.zeros_like(sum_ref)
        ssq_ref[...] = jnp.zeros_like(ssq_ref)

    @pl.when(p == 0)
    def _accumulate():
        if needs_mask:
            row = t * tb + lax.broadcasted_iota(jnp.int32, (tb, 1), 0)
            zm = jnp.where(row < batch, z, 0.0)
        else:
            zm = z
        sum_ref[...] = sum_ref[...] + jnp.sum(zm, axis=0, keepdims=True)
        ssq_ref[...] = ssq_ref[...] + jnp.sum(zm * zm, axis=0, keepdims=True)

    @pl.when(jnp.logical_and(p == 1, t == 0))
    def _finalize():
        inv_n = jnp.float32(1.0 / batch)
        mean = sum_ref[...] * inv_n
        var = ssq_ref[...] * inv_n - mean * mean
        scale = bgb[1:2, :] * lax.rsqrt(var + BN_EPS)
        scale_ref[...] = scale
        shift_ref[...] = bgb[2:3, :] - mean * scale

    @pl.when(p == 1)
    def _apply():
        # Dropout(p=0.0) == identity; activation == sigmoid.
        o_ref[...] = jax.nn.sigmoid(z * scale_ref[...] + shift_ref[...])


def _bn_layer_tiled(x, w, bgb, *, tb):
    B, in_dim = x.shape
    out_dim = w.shape[1]
    nt = pl.cdiv(B, tb)
    needs_mask = (B % tb) != 0

    kernel = functools.partial(_bn_layer_kernel, batch=B, tb=tb,
                               needs_mask=needs_mask)

    flops = 2 * (2 * B * in_dim * out_dim) + 8 * B * out_dim
    byts = 4 * (2 * B * in_dim + B * out_dim + in_dim * out_dim + 3 * out_dim)

    return pl.pallas_call(
        kernel,
        grid=(2, nt),
        in_specs=[
            pl.BlockSpec((tb, in_dim), lambda p, t: (t, 0)),       # streamed x
            pl.BlockSpec((in_dim, out_dim), lambda p, t: (0, 0)),  # resident W
            pl.BlockSpec((3, out_dim), lambda p, t: (0, 0)),       # resident b/g/beta
        ],
        out_specs=pl.BlockSpec((tb, out_dim), lambda p, t: (t, 0)),
        scratch_shapes=[pltpu.VMEM((1, out_dim), jnp.float32)] * 4,
        out_shape=jax.ShapeDtypeStruct((B, out_dim), jnp.float32),
        compiler_params=pltpu.CompilerParams(
            dimension_semantics=("arbitrary", "arbitrary")),
        cost_estimate=pl.CostEstimate(flops=int(flops),
                                      transcendentals=int(B * out_dim),
                                      bytes_accessed=int(byts)),
    )(x, w, bgb)


def _out_layer_kernel(x_ref, w_ref, b_ref, o_ref):
    z = jnp.dot(x_ref[...], w_ref[...], preferred_element_type=jnp.float32) + b_ref[...]
    o_ref[...] = jnp.tanh(z)


def _out_layer_tiled(x, w, b, *, tb):
    B, in_dim = x.shape
    out_dim = w.shape[1]
    nt = pl.cdiv(B, tb)

    flops = 2 * B * in_dim * out_dim + 2 * B * out_dim
    byts = 4 * (B * in_dim + B * out_dim + in_dim * out_dim + out_dim)

    return pl.pallas_call(
        _out_layer_kernel,
        grid=(nt,),
        in_specs=[
            pl.BlockSpec((tb, in_dim), lambda t: (t, 0)),
            pl.BlockSpec((in_dim, out_dim), lambda t: (0, 0)),
            pl.BlockSpec((1, out_dim), lambda t: (0, 0)),
        ],
        out_specs=pl.BlockSpec((tb, out_dim), lambda t: (t, 0)),
        out_shape=jax.ShapeDtypeStruct((B, out_dim), jnp.float32),
        compiler_params=pltpu.CompilerParams(dimension_semantics=("parallel",)),
        cost_estimate=pl.CostEstimate(flops=int(flops),
                                      transcendentals=int(B * out_dim),
                                      bytes_accessed=int(byts)),
    )(x, w, b)


def _ann_forward_tiled(x, packed, *, tb):
    ws, bgbs, w_out, b_out = packed
    B = x.shape[0]
    if tb >= B:
        tb = B                     # single full-batch tile
    else:
        tb = max(8, (tb // 8) * 8)  # sublane-aligned batch tile

    h = x
    for w, bgb in zip(ws, bgbs):
        h = _bn_layer_tiled(h, w, bgb, tb=tb)
    return _out_layer_tiled(h, w_out, b_out, tb=tb)


# ---------------------------------------------------------------------------
# Public entry point
# ---------------------------------------------------------------------------
def ann_forward(x, params, *, tile_batch=2048, small_batch_threshold=4096):
    x = jnp.asarray(x, jnp.float32)
    packed = _pack_params(params)
    if x.shape[0] <= small_batch_threshold:
        return _ann_forward_fused(x, packed)
    return _ann_forward_tiled(x, packed, tb=tile_batch)


# ---------------------------------------------------------------------------
# Init + pure-JAX reference
# ---------------------------------------------------------------------------
def init_params(key, input_dim=5, hidden_dim=(128, 128, 64, 32), output_dim=1):
    """Deterministic init mimicking PyTorch Linear defaults (U(-1/sqrt(fan_in), ..))."""
    dims = [input_dim] + list(hidden_dim)
    hidden = []
    for i in range(len(dims) - 1):
        key, k1, k2 = jax.random.split(key, 3)
        bound = 1.0 / float(dims[i]) ** 0.5
        w = jax.random.uniform(k1, (dims[i], dims[i + 1]), jnp.float32, -bound, bound)
        b = jax.random.uniform(k2, (1, dims[i + 1]), jnp.float32, -bound, bound)
        g = jnp.ones((1, dims[i + 1]), jnp.float32)       # BN weight (gamma)
        beta = jnp.zeros((1, dims[i + 1]), jnp.float32)   # BN bias (beta)
        hidden.append((w, b, g, beta))
    key, k1, k2 = jax.random.split(key, 3)
    bound = 1.0 / float(dims[-1]) ** 0.5
    w_out = jax.random.uniform(k1, (dims[-1], output_dim), jnp.float32, -bound, bound)
    b_out = jax.random.uniform(k2, (1, output_dim), jnp.float32, -bound, bound)
    return {"hidden": hidden, "out": (w_out, b_out)}


def ann_reference(x, params):
    """Pure-JAX reference (two-pass variance) for correctness checking."""
    h = x
    for (w, b, g, beta) in params["hidden"]:
        z = h @ w + b
        mean = jnp.mean(z, axis=0, keepdims=True)
        var = jnp.mean((z - mean) ** 2, axis=0, keepdims=True)
        z = (z - mean) * lax.rsqrt(var + BN_EPS) * g + beta
        h = jax.nn.sigmoid(z)
    w_out, b_out = params["out"]
    return jnp.tanh(h @ w_out + b_out)


if __name__ == "__main__":
    key = jax.random.PRNGKey(0)
    key, k_x, k_p, k_x2 = jax.random.split(key, 4)

    batch, input_dim = 8, 5
    x = jax.random.normal(k_x, (batch, input_dim), dtype=jnp.float32)
    params = init_params(k_p, input_dim=input_dim,
                         hidden_dim=(128, 128, 64, 32), output_dim=1)

    # Small batch -> single fused whole-network kernel.
    out = jax.block_until_ready(ann_forward(x, params))
    ref = ann_reference(x, params)
    assert out.shape == (batch, 1), out.shape
    assert jnp.allclose(out, ref, atol=1e-5, rtol=1e-5), \
        f"fused path max abs err {jnp.max(jnp.abs(out - ref))}"

    # Larger batch -> batch-tiled path with two-pass full-batch BatchNorm
    # (1000 is not a multiple of the 256-row tile, exercising the row mask).
    big_batch = 1000
    x_big = jax.random.normal(k_x2, (big_batch, input_dim), dtype=jnp.float32)
    out_big = jax.block_until_ready(
        ann_forward(x_big, params, tile_batch=256, small_batch_threshold=0))
    ref_big = ann_reference(x_big, params)
    assert out_big.shape == (big_batch, 1), out_big.shape
    assert jnp.allclose(out_big, ref_big, atol=1e-4, rtol=1e-4), \
        f"tiled path max abs err {jnp.max(jnp.abs(out_big - ref_big))}"

    print("KERNEL_OK")
</pallas_src>

<mosaic_0001>
module attributes {stable_mosaic.version = 11 : i64} {
  func.func @_ann_fused_kernel(%arg0: memref<8x5xf32, #tpu.memory_space<vmem>>, %arg1: memref<5x128xf32, #tpu.memory_space<vmem>>, %arg2: memref<3x128xf32, #tpu.memory_space<vmem>>, %arg3: memref<128x128xf32, #tpu.memory_space<vmem>>, %arg4: memref<3x128xf32, #tpu.memory_space<vmem>>, %arg5: memref<128x64xf32, #tpu.memory_space<vmem>>, %arg6: memref<3x64xf32, #tpu.memory_space<vmem>>, %arg7: memref<64x32xf32, #tpu.memory_space<vmem>>, %arg8: memref<3x32xf32, #tpu.memory_space<vmem>>, %arg9: memref<32x1xf32, #tpu.memory_space<vmem>>, %arg10: memref<1x1xf32, #tpu.memory_space<vmem>>, %arg11: memref<8x1xf32, #tpu.memory_space<vmem>>) attributes {dimension_semantics = [], scalar_prefetch = 0 : i64, scratch_operands = 0 : i64, tpu.core_type = #tpu.core_type<tc>} {
    %c0 = arith.constant 0 : index
    %c0_0 = arith.constant 0 : index
    %0 = vector.load %arg0[%c0, %c0_0] : memref<8x5xf32, #tpu.memory_space<vmem>>, vector<8x5xf32>
    %c0_1 = arith.constant 0 : index
    %c0_2 = arith.constant 0 : index
    %1 = vector.load %arg2[%c0_1, %c0_2] : memref<3x128xf32, #tpu.memory_space<vmem>>, vector<3x128xf32>
    %2 = vector.extract_strided_slice %1 {offsets = [0, 0], sizes = [1, 128], strides = [1, 1]} : vector<3x128xf32> to vector<1x128xf32>
    %3 = vector.extract_strided_slice %1 {offsets = [1, 0], sizes = [1, 128], strides = [1, 1]} : vector<3x128xf32> to vector<1x128xf32>
    %4 = vector.extract_strided_slice %1 {offsets = [2, 0], sizes = [1, 128], strides = [1, 1]} : vector<3x128xf32> to vector<1x128xf32>
    %c0_3 = arith.constant 0 : index
    %c0_4 = arith.constant 0 : index
    %5 = vector.load %arg1[%c0_3, %c0_4] : memref<5x128xf32, #tpu.memory_space<vmem>>, vector<5x128xf32>
    %cst = arith.constant dense<0.000000e+00> : vector<8x128xf32>
    %6 = tpu.matmul %0, %5, %cst {dimension_numbers = #tpu.dot_dimension_numbers<[1], [0], [0], [1], [0, 0, 1, 1], [], []>} : vector<8x5xf32>, vector<5x128xf32>, vector<8x128xf32> -> vector<8x128xf32>
    %7 = vector.broadcast %2 : vector<1x128xf32> to vector<8x128xf32>
    %8 = arith.addf %6, %7 : vector<8x128xf32>
    %cst_5 = arith.constant dense<0.000000e+00> : vector<128xf32>
    %9 = vector.multi_reduction <add>, %8, %cst_5 [0] : vector<8x128xf32> to vector<128xf32>
    %10 = vector.shape_cast %9 : vector<128xf32> to vector<1x128xf32>
    %11 = arith.mulf %8, %8 : vector<8x128xf32>
    %cst_6 = arith.constant dense<0.000000e+00> : vector<128xf32>
    %12 = vector.multi_reduction <add>, %11, %cst_6 [0] : vector<8x128xf32> to vector<128xf32>
    %13 = vector.shape_cast %12 : vector<128xf32> to vector<1x128xf32>
    %cst_7 = arith.constant 1.250000e-01 : f32
    %14 = vector.broadcast %cst_7 : f32 to vector<1x128xf32>
    %15 = arith.mulf %10, %14 : vector<1x128xf32>
    %cst_8 = arith.constant 1.250000e-01 : f32
    %16 = vector.broadcast %cst_8 : f32 to vector<1x128xf32>
    %17 = arith.mulf %13, %16 : vector<1x128xf32>
    %18 = arith.mulf %15, %15 : vector<1x128xf32>
    %19 = arith.subf %17, %18 : vector<1x128xf32>
    %cst_9 = arith.constant 9.99999974E-6 : f32
    %20 = vector.broadcast %cst_9 : f32 to vector<1x128xf32>
    %21 = arith.addf %19, %20 : vector<1x128xf32>
    %22 = math.rsqrt %21 : vector<1x128xf32>
    %23 = arith.mulf %3, %22 : vector<1x128xf32>
    %24 = arith.mulf %15, %23 : vector<1x128xf32>
    %25 = arith.subf %4, %24 : vector<1x128xf32>
    %26 = vector.broadcast %23 : vector<1x128xf32> to vector<8x128xf32>
    %27 = arith.mulf %8, %26 : vector<8x128xf32>
    %28 = vector.broadcast %25 : vector<1x128xf32> to vector<8x128xf32>
    %29 = arith.addf %27, %28 : vector<8x128xf32>
    %30 = arith.negf %29 : vector<8x128xf32>
    %31 = math.exp %30 : vector<8x128xf32>
    %cst_10 = arith.constant 1.000000e+00 : f32
    %32 = vector.broadcast %cst_10 : f32 to vector<8x128xf32>
    %33 = arith.addf %32, %31 : vector<8x128xf32>
    %34 = arith.divf %32, %33 : vector<8x128xf32>
    %c0_11 = arith.constant 0 : index
    %c0_12 = arith.constant 0 : index
    %35 = vector.load %arg4[%c0_11, %c0_12] : memref<3x128xf32, #tpu.memory_space<vmem>>, vector<3x128xf32>
    %36 = vector.extract_strided_slice %35 {offsets = [0, 0], sizes = [1, 128], strides = [1, 1]} : vector<3x128xf32> to vector<1x128xf32>
    %37 = vector.extract_strided_slice %35 {offsets = [1, 0], sizes = [1, 128], strides = [1, 1]} : vector<3x128xf32> to vector<1x128xf32>
    %38 = vector.extract_strided_slice %35 {offsets = [2, 0], sizes = [1, 128], strides = [1, 1]} : vector<3x128xf32> to vector<1x128xf32>
    %c0_13 = arith.constant 0 : index
    %c0_14 = arith.constant 0 : index
    %39 = vector.load %arg3[%c0_13, %c0_14] : memref<128x128xf32, #tpu.memory_space<vmem>>, vector<128x128xf32>
    %cst_15 = arith.constant dense<0.000000e+00> : vector<8x128xf32>
    %40 = tpu.matmul %34, %39, %cst_15 {dimension_numbers = #tpu.dot_dimension_numbers<[1], [0], [0], [1], [0, 0, 1, 1], [], []>} : vector<8x128xf32>, vector<128x128xf32>, vector<8x128xf32> -> vector<8x128xf32>
    %41 = vector.broadcast %36 : vector<1x128xf32> to vector<8x128xf32>
    %42 = arith.addf %40, %41 : vector<8x128xf32>
    %cst_16 = arith.constant dense<0.000000e+00> : vector<128xf32>
    %43 = vector.multi_reduction <add>, %42, %cst_16 [0] : vector<8x128xf32> to vector<128xf32>
    %44 = vector.shape_cast %43 : vector<128xf32> to vector<1x128xf32>
    %45 = arith.mulf %42, %42 : vector<8x128xf32>
    %cst_17 = arith.constant dense<0.000000e+00> : vector<128xf32>
    %46 = vector.multi_reduction <add>, %45, %cst_17 [0] : vector<8x128xf32> to vector<128xf32>
    %47 = vector.shape_cast %46 : vector<128xf32> to vector<1x128xf32>
    %cst_18 = arith.constant 1.250000e-01 : f32
    %48 = vector.broadcast %cst_18 : f32 to vector<1x128xf32>
    %49 = arith.mulf %44, %48 : vector<1x128xf32>
    %cst_19 = arith.constant 1.250000e-01 : f32
    %50 = vector.broadcast %cst_19 : f32 to vector<1x128xf32>
    %51 = arith.mulf %47, %50 : vector<1x128xf32>
    %52 = arith.mulf %49, %49 : vector<1x128xf32>
    %53 = arith.subf %51, %52 : vector<1x128xf32>
    %cst_20 = arith.constant 9.99999974E-6 : f32
    %54 = vector.broadcast %cst_20 : f32 to vector<1x128xf32>
    %55 = arith.addf %53, %54 : vector<1x128xf32>
    %56 = math.rsqrt %55 : vector<1x128xf32>
    %57 = arith.mulf %37, %56 : vector<1x128xf32>
    %58 = arith.mulf %49, %57 : vector<1x128xf32>
    %59 = arith.subf %38, %58 : vector<1x128xf32>
    %60 = vector.broadcast %57 : vector<1x128xf32> to vector<8x128xf32>
    %61 = arith.mulf %42, %60 : vector<8x128xf32>
    %62 = vector.broadcast %59 : vector<1x128xf32> to vector<8x128xf32>
    %63 = arith.addf %61, %62 : vector<8x128xf32>
    %64 = arith.negf %63 : vector<8x128xf32>
    %65 = math.exp %64 : vector<8x128xf32>
    %cst_21 = arith.constant 1.000000e+00 : f32
    %66 = vector.broadcast %cst_21 : f32 to vector<8x128xf32>
    %67 = arith.addf %66, %65 : vector<8x128xf32>
    %68 = arith.divf %66, %67 : vector<8x128xf32>
    %c0_22 = arith.constant 0 : index
    %c0_23 = arith.constant 0 : index
    %69 = vector.load %arg6[%c0_22, %c0_23] : memref<3x64xf32, #tpu.memory_space<vmem>>, vector<3x64xf32>
    %70 = vector.extract_strided_slice %69 {offsets = [0, 0], sizes = [1, 64], strides = [1, 1]} : vector<3x64xf32> to vector<1x64xf32>
    %71 = vector.extract_strided_slice %69 {offsets = [1, 0], sizes = [1, 64], strides = [1, 1]} : vector<3x64xf32> to vector<1x64xf32>
    %72 = vector.extract_strided_slice %69 {offsets = [2, 0], sizes = [1, 64], strides = [1, 1]} : vector<3x64xf32> to vector<1x64xf32>
    %c0_24 = arith.constant 0 : index
    %c0_25 = arith.constant 0 : index
    %73 = vector.load %arg5[%c0_24, %c0_25] : memref<128x64xf32, #tpu.memory_space<vmem>>, vector<128x64xf32>
    %cst_26 = arith.constant dense<0.000000e+00> : vector<8x64xf32>
    %74 = tpu.matmul %68, %73, %cst_26 {dimension_numbers = #tpu.dot_dimension_numbers<[1], [0], [0], [1], [0, 0, 1, 1], [], []>} : vector<8x128xf32>, vector<128x64xf32>, vector<8x64xf32> -> vector<8x64xf32>
    %75 = vector.broadcast %70 : vector<1x64xf32> to vector<8x64xf32>
    %76 = arith.addf %74, %75 : vector<8x64xf32>
    %cst_27 = arith.constant dense<0.000000e+00> : vector<64xf32>
    %77 = vector.multi_reduction <add>, %76, %cst_27 [0] : vector<8x64xf32> to vector<64xf32>
    %78 = vector.shape_cast %77 : vector<64xf32> to vector<1x64xf32>
    %79 = arith.mulf %76, %76 : vector<8x64xf32>
    %cst_28 = arith.constant dense<0.000000e+00> : vector<64xf32>
    %80 = vector.multi_reduction <add>, %79, %cst_28 [0] : vector<8x64xf32> to vector<64xf32>
    %81 = vector.shape_cast %80 : vector<64xf32> to vector<1x64xf32>
    %cst_29 = arith.constant 1.250000e-01 : f32
    %82 = vector.broadcast %cst_29 : f32 to vector<1x64xf32>
    %83 = arith.mulf %78, %82 : vector<1x64xf32>
    %cst_30 = arith.constant 1.250000e-01 : f32
    %84 = vector.broadcast %cst_30 : f32 to vector<1x64xf32>
    %85 = arith.mulf %81, %84 : vector<1x64xf32>
    %86 = arith.mulf %83, %83 : vector<1x64xf32>
    %87 = arith.subf %85, %86 : vector<1x64xf32>
    %cst_31 = arith.constant 9.99999974E-6 : f32
    %88 = vector.broadcast %cst_31 : f32 to vector<1x64xf32>
    %89 = arith.addf %87, %88 : vector<1x64xf32>
    %90 = math.rsqrt %89 : vector<1x64xf32>
    %91 = arith.mulf %71, %90 : vector<1x64xf32>
    %92 = arith.mulf %83, %91 : vector<1x64xf32>
    %93 = arith.subf %72, %92 : vector<1x64xf32>
    %94 = vector.broadcast %91 : vector<1x64xf32> to vector<8x64xf32>
    %95 = arith.mulf %76, %94 : vector<8x64xf32>
    %96 = vector.broadcast %93 : vector<1x64xf32> to vector<8x64xf32>
    %97 = arith.addf %95, %96 : vector<8x64xf32>
    %98 = arith.negf %97 : vector<8x64xf32>
    %99 = math.exp %98 : vector<8x64xf32>
    %cst_32 = arith.constant 1.000000e+00 : f32
    %100 = vector.broadcast %cst_32 : f32 to vector<8x64xf32>
    %101 = arith.addf %100, %99 : vector<8x64xf32>
    %102 = arith.divf %100, %101 : vector<8x64xf32>
    %c0_33 = arith.constant 0 : index
    %c0_34 = arith.constant 0 : index
    %103 = vector.load %arg8[%c0_33, %c0_34] : memref<3x32xf32, #tpu.memory_space<vmem>>, vector<3x32xf32>
    %104 = vector.extract_strided_slice %103 {offsets = [0, 0], sizes = [1, 32], strides = [1, 1]} : vector<3x32xf32> to vector<1x32xf32>
    %105 = vector.extract_strided_slice %103 {offsets = [1, 0], sizes = [1, 32], strides = [1, 1]} : vector<3x32xf32> to vector<1x32xf32>
    %106 = vector.extract_strided_slice %103 {offsets = [2, 0], sizes = [1, 32], strides = [1, 1]} : vector<3x32xf32> to vector<1x32xf32>
    %c0_35 = arith.constant 0 : index
    %c0_36 = arith.constant 0 : index
    %107 = vector.load %arg7[%c0_35, %c0_36] : memref<64x32xf32, #tpu.memory_space<vmem>>, vector<64x32xf32>
    %cst_37 = arith.constant dense<0.000000e+00> : vector<8x32xf32>
    %108 = tpu.matmul %102, %107, %cst_37 {dimension_numbers = #tpu.dot_dimension_numbers<[1], [0], [0], [1], [0, 0, 1, 1], [], []>} : vector<8x64xf32>, vector<64x32xf32>, vector<8x32xf32> -> vector<8x32xf32>
    %109 = vector.broadcast %104 : vector<1x32xf32> to vector<8x32xf32>
    %110 = arith.addf %108, %109 : vector<8x32xf32>
    %cst_38 = arith.constant dense<0.000000e+00> : vector<32xf32>
    %111 = vector.multi_reduction <add>, %110, %cst_38 [0] : vector<8x32xf32> to vector<32xf32>
    %112 = vector.shape_cast %111 : vector<32xf32> to vector<1x32xf32>
    %113 = arith.mulf %110, %110 : vector<8x32xf32>
    %cst_39 = arith.constant dense<0.000000e+00> : vector<32xf32>
    %114 = vector.multi_reduction <add>, %113, %cst_39 [0] : vector<8x32xf32> to vector<32xf32>
    %115 = vector.shape_cast %114 : vector<32xf32> to vector<1x32xf32>
    %cst_40 = arith.constant 1.250000e-01 : f32
    %116 = vector.broadcast %cst_40 : f32 to vector<1x32xf32>
    %117 = arith.mulf %112, %116 : vector<1x32xf32>
    %cst_41 = arith.constant 1.250000e-01 : f32
    %118 = vector.broadcast %cst_41 : f32 to vector<1x32xf32>
    %119 = arith.mulf %115, %118 : vector<1x32xf32>
    %120 = arith.mulf %117, %117 : vector<1x32xf32>
    %121 = arith.subf %119, %120 : vector<1x32xf32>
    %cst_42 = arith.constant 9.99999974E-6 : f32
    %122 = vector.broadcast %cst_42 : f32 to vector<1x32xf32>
    %123 = arith.addf %121, %122 : vector<1x32xf32>
    %124 = math.rsqrt %123 : vector<1x32xf32>
    %125 = arith.mulf %105, %124 : vector<1x32xf32>
    %126 = arith.mulf %117, %125 : vector<1x32xf32>
    %127 = arith.subf %106, %126 : vector<1x32xf32>
    %128 = vector.broadcast %125 : vector<1x32xf32> to vector<8x32xf32>
    %129 = arith.mulf %110, %128 : vector<8x32xf32>
    %130 = vector.broadcast %127 : vector<1x32xf32> to vector<8x32xf32>
    %131 = arith.addf %129, %130 : vector<8x32xf32>
    %132 = arith.negf %131 : vector<8x32xf32>
    %133 = math.exp %132 : vector<8x32xf32>
    %cst_43 = arith.constant 1.000000e+00 : f32
    %134 = vector.broadcast %cst_43 : f32 to vector<8x32xf32>
    %135 = arith.addf %134, %133 : vector<8x32xf32>
    %136 = arith.divf %134, %135 : vector<8x32xf32>
    %c0_44 = arith.constant 0 : index
    %c0_45 = arith.constant 0 : index
    %137 = vector.load %arg9[%c0_44, %c0_45] : memref<32x1xf32, #tpu.memory_space<vmem>>, vector<32x1xf32>
    %cst_46 = arith.constant dense<0.000000e+00> : vector<8x1xf32>
    %138 = tpu.matmul %136, %137, %cst_46 {dimension_numbers = #tpu.dot_dimension_numbers<[1], [0], [0], [1], [0, 0, 1, 1], [], []>} : vector<8x32xf32>, vector<32x1xf32>, vector<8x1xf32> -> vector<8x1xf32>
    %c0_47 = arith.constant 0 : index
    %c0_48 = arith.constant 0 : index
    %139 = vector.load %arg10[%c0_47, %c0_48] : memref<1x1xf32, #tpu.memory_space<vmem>>, vector<1x1xf32>
    %140 = vector.broadcast %139 : vector<1x1xf32> to vector<8x1xf32>
    %141 = arith.addf %138, %140 : vector<8x1xf32>
    %142 = math.tanh %141 : vector<8x1xf32>
    %c0_49 = arith.constant 0 : index
    %c0_50 = arith.constant 0 : index
    %143 = vector.load %arg11[%c0_49, %c0_50] : memref<8x1xf32, #tpu.memory_space<vmem>>, vector<8x1xf32>
    tpu.vector_store %arg11[%c0_49, %c0_50], %142 {strides = array<i32>} : memref<8x1xf32, #tpu.memory_space<vmem>>, vector<8x1xf32>,
    return
  }
}

</mosaic_0001>

<bundles_post_ra>
// kernel: tpu_custom_call.1
= control target key start
LH: loop header
LB: loop body
LE: loop exit
PB: predicated region body
PF: predicated region fallthrough
CT: control target
= control target key end

     0   :  { %vm51_vm0 = vcmask 1044480   ;;  %vm47_vm1 = vcmask 39936   ;;  %v913_v0 = vmov 0.0   ;;  %vm914_vm2 = vmmov 0   ;;  %s1189_s1 = inlined_call_operand.vmem [shape: f32[5,128], index: 1, kind: input, shape index: {}]   ;;  %s1190_s0 = inlined_call_operand.vmem [shape: f32[8,5], index: 0, kind: input, shape index: {}]   ;;  %s1191_s3 = inlined_call_operand.vmem [shape: f32[128,128], index: 3, kind: input, shape index: {}]   ;;  %s1192_s2 = inlined_call_operand.vmem [shape: f32[3,128], index: 2, kind: input, shape index: {}]   ;;  %s1193_s5 = inlined_call_operand.vmem [shape: f32[128,64], index: 5, kind: input, shape index: {}]   ;;  %s1194_s4 = inlined_call_operand.vmem [shape: f32[3,128], index: 4, kind: input, shape index: {}]   ;;  %s1195_s7 = inlined_call_operand.vmem [shape: f32[64,32], index: 7, kind: input, shape index: {}]   ;;  %s1196_s6 = inlined_call_operand.vmem [shape: f32[3,64], index: 6, kind: input, shape index: {}]   ;;  %s1197_s9 = inlined_call_operand.vmem [shape: f32[32,1], index: 9, kind: input, shape index: {}]   ;;  %s1198_s10 = inlined_call_operand.<no memory space> [shape: f32[1,1], index: 10, kind: input, shape index: {}]   ;;  %s1199_s8 = inlined_call_operand.vmem [shape: f32[3,32], index: 8, kind: input, shape index: {}]   ;;  %s1200_s11 = inlined_call_operand.vmem [shape: f32[8,1], index: 11, kind: output, shape index: {}]  }
   0x1   :  { %713 = vmatprep.subr.mxu0 %v913_v0  ;;  %v42_v1 = vld [vmem:[%s1189_s1] sm:$0x1f]  ;;  %715 = vmatprep.mubr.msk.f32.mxu0 %vm914_vm2, %v913_v0  ;;  %v168_v4 = vld [vmem:[%s1191_s3 + $0x8] sm:$0xff]  ;;  %v915_v6 = vmov 0.0|0.0   ;;  %v169_v7 = vld [vmem:[%s1191_s3 + $0x10] sm:$0xff]  ;;  %v43_v28 = vlaneseq  ;;  %vm389_vm3 = vcmask 523264  }
   0x2   :  { %v40_v2 = vld [vmem:[%s1190_s0] sm:$0xff]  ;;  %714 = vmatpush3.msk.msra.mxu0 %vm51_vm0, %v42_v1  ;;  %750 = vmatprep.mubr.msk.f32.mxu1 %vm914_vm2, %v913_v0  ;;  %v170_v8 = vld [vmem:[%s1191_s3 + $0x18] sm:$0xff]  ;;  %v172_v11 = vld [vmem:[%s1191_s3 + $0x28] sm:$0xff]  ;;  %vm519_vm4 = vcmask 261120   ;;  %vm648_vm5 = vcmask 7168  }
   0x3   :  { %716 = vmatmul.mubr.msk.f32.vlgmr.msra.gmra.mrb[0].mxu0 %vm47_vm1, %v40_v2  ;;  %v167_v3 = vld [vmem:[%s1191_s3] sm:$0xff]  ;;  %818 = vmatprep.subr.bf16.mxu1 %v915_v6  ;;  %v822_v9 = vpack.c.bf16 %v170_v8, %v169_v7  ;;  %v173_v13 = vld [vmem:[%s1191_s3 + $0x30] sm:$0xff]  ;;  %v174_v14 = vld [vmem:[%s1191_s3 + $0x38] sm:$0xff]  ;;  %v44_v29 = vshrl.u32 %v43_v28, 7 }
   0x4   :  { %785 = vmatprep.mubr.msk.f32.mxu0 %vm914_vm2, %v913_v0  ;;  %v819_v5 = vpack.c.bf16 %v168_v4, %v167_v3  ;;  %842 = vmatprep.subr.bf16.mxu0 %v915_v6  ;;  %v171_v10 = vld [vmem:[%s1191_s3 + $0x20] sm:$0xff]  ;;  %v828_v15 = vpack.c.bf16 %v174_v14, %v173_v13  ;;  %v176_v17 = vld [vmem:[%s1191_s3 + $0x48] sm:$0xff]  ;;  %v177_v19 = vld [vmem:[%s1191_s3 + $0x50] sm:$0xff] }
   0x5   :  { %v825_v12 = vpack.c.bf16 %v172_v11, %v171_v10  ;;  %v175_v16 = vld [vmem:[%s1191_s3 + $0x40] sm:$0xff]  ;;  %v178_v20 = vld [vmem:[%s1191_s3 + $0x58] sm:$0xff]  ;;  %v180_v23 = vld [vmem:[%s1191_s3 + $0x68] sm:$0xff]  ;;  %v1047_v30 = vsub.s32 0, %v44_v29  ;;  %v1053_v56 = vsub.s32 1, %v44_v29  ;;  %v1056_v60 = vsub.s32 2, %v44_v29 }
   0x6   :  { %820 = vmatpush3.bf16.msra.mxu1 %v819_v5  ;;  %v831_v18 = vpack.c.bf16 %v176_v17, %v175_v16  ;;  %v834_v21 = vpack.c.bf16 %v178_v20, %v177_v19  ;;  %v179_v22 = vld [vmem:[%s1191_s3 + $0x60] sm:$0xff]  ;;  %v181_v25 = vld [vmem:[%s1191_s3 + $0x70] sm:$0xff]  ;;  %v182_v26 = vld [vmem:[%s1191_s3 + $0x78] sm:$0xff] }
   0x7   :  { %821 = vmatprep.subr.bf16.mxu1 %v915_v6  ;;  %v837_v24 = vpack.c.bf16 %v180_v23, %v179_v22  ;;  %v840_v27 = vpack.c.bf16 %v182_v26, %v181_v25  ;;  %v41_v31 = vld [vmem:[%s1192_s2] sm:$0x7]  ;;  %v300_v8 = vld [vmem:[%s1193_s5 + $0x8] sm:$0xff]  ;;  %v301_v10 = vld [vmem:[%s1193_s5 + $0x10] sm:$0xff] }
   0x8   :  { %v46_v32 = vrot.slane %v41_v31, %v1047_v30  ;;  %v299_v7 = vld [vmem:[%s1193_s5] sm:$0xff]  ;;  %v302_v11 = vld [vmem:[%s1193_s5 + $0x18] sm:$0xff]  ;;  %v304_v14 = vld [vmem:[%s1193_s5 + $0x28] sm:$0xff] }
   0x9   :  { %v303_v13 = vld [vmem:[%s1193_s5 + $0x20] sm:$0xff]  ;;  %v305_v16 = vld [vmem:[%s1193_s5 + $0x30] sm:$0xff]  ;;  %v306_v17 = vld [vmem:[%s1193_s5 + $0x38] sm:$0xff] }
   0xa   :  { %823 = vmatpush3.bf16.msra.mxu1 %v822_v9  ;;  %v843_v9 = vpack.c.bf16 %v300_v8, %v299_v7  ;;  %v307_v19 = vld [vmem:[%s1193_s5 + $0x40] sm:$0xff]  ;;  %v308_v20 = vld [vmem:[%s1193_s5 + $0x48] sm:$0xff]  ;;  %v309_v22 = vld [vmem:[%s1193_s5 + $0x50] sm:$0xff] }
   0xb   :  { %824 = vmatprep.subr.bf16.mxu1 %v915_v6  ;;  %v310_v23 = vld [vmem:[%s1193_s5 + $0x58] sm:$0xff]  ;;  %v311_v25 = vld [vmem:[%s1193_s5 + $0x60] sm:$0xff]  ;;  %v312_v26 = vld [vmem:[%s1193_s5 + $0x68] sm:$0xff] }
   0xc   :  { %844 = vmatpush3.bf16.msra.mxu0 %v843_v9  ;;  %v313_v28 = vld [vmem:[%s1193_s5 + $0x70] sm:$0xff]  ;;  %v314_v29 = vld [vmem:[%s1193_s5 + $0x78] sm:$0xff]  ;;  %v434_v8 = vld [vmem:[%s1195_s7] sm:$0xff] }
   0xd   :  { %845 = vmatprep.subr.bf16.mxu0 %v915_v6  ;;  %v435_v9 = vld [vmem:[%s1195_s7 + $0x8] sm:$0xff] }
   0xe   :  { %826 = vmatpush3.bf16.msra.mxu1 %v825_v12  ;;  %v846_v12 = vpack.c.bf16 %v302_v11, %v301_v10  ;;  %v867_v10 = vpack.c.bf16 %v435_v9, %v434_v8  ;;  %v436_v11 = vld [vmem:[%s1195_s7 + $0x10] sm:$0xff] }
   0xf   :  { %827 = vmatprep.subr.bf16.mxu1 %v915_v6 }
  0x10   :  { %847 = vmatpush3.bf16.msra.mxu0 %v846_v12 }
  0x11   :  { %848 = vmatprep.subr.bf16.mxu0 %v915_v6 }
  0x12   :  { %829 = vmatpush3.bf16.msra.mxu1 %v828_v15  ;;  %v849_v15 = vpack.c.bf16 %v304_v14, %v303_v13  ;;  %v438_v13 = vld [vmem:[%s1195_s7 + $0x20] sm:$0xff]  ;;  %v439_v14 = vld [vmem:[%s1195_s7 + $0x28] sm:$0xff] }
  0x13   :  { %830 = vmatprep.subr.bf16.mxu1 %v915_v6 }
  0x14   :  { %850 = vmatpush3.bf16.msra.mxu0 %v849_v15  ;;  %v873_v15 = vpack.c.bf16 %v439_v14, %v438_v13 }
  0x15   :  { %851 = vmatprep.subr.bf16.mxu0 %v915_v6 }
  0x16   :  { %832 = vmatpush3.bf16.msra.mxu1 %v831_v18  ;;  %v852_v18 = vpack.c.bf16 %v306_v17, %v305_v16  ;;  %v440_v16 = vld [vmem:[%s1195_s7 + $0x30] sm:$0xff]  ;;  %v441_v17 = vld [vmem:[%s1195_s7 + $0x38] sm:$0xff] }
  0x17   :  { %833 = vmatprep.subr.bf16.mxu1 %v915_v6 }
  0x18   :  { %853 = vmatpush3.bf16.msra.mxu0 %v852_v18  ;;  %v876_v18 = vpack.c.bf16 %v441_v17, %v440_v16 }
  0x19   :  { %854 = vmatprep.subr.bf16.mxu0 %v915_v6 }
  0x1a   :  { %835 = vmatpush3.bf16.msra.mxu1 %v834_v21  ;;  %v855_v21 = vpack.c.bf16 %v308_v20, %v307_v19  ;;  %v298_v19 = vld [vmem:[%s1196_s6] sm:$0x7] }
  0x1b   :  { %836 = vmatprep.subr.bf16.mxu1 %v915_v6  ;;  %v318_v20 = vrot.slane %v298_v19, %v1047_v30 }
  0x1c   :  { %856 = vmatpush3.bf16.msra.mxu0 %v855_v21 }
  0x1d   :  { %857 = vmatprep.subr.bf16.mxu0 %v915_v6 }
  0x1e   :  { %838 = vmatpush3.bf16.msra.mxu1 %v837_v24  ;;  %v858_v24 = vpack.c.bf16 %v310_v23, %v309_v22 }
  0x1f   :  { %839 = vmatprep.subr.bf16.mxu1 %v915_v6 }
  0x20   :  { %859 = vmatpush3.bf16.msra.mxu0 %v858_v24 }
  0x21   :  { %860 = vmatprep.subr.bf16.mxu0 %v915_v6 }
  0x22   :  { %841 = vmatpush3.bf16.msra.mxu1 %v840_v27  ;;  %v861_v27 = vpack.c.bf16 %v312_v26, %v311_v25 }
  0x23   :  { %866 = vmatprep.subr.bf16.mxu1 %v915_v6 }
  0x24   :  { %862 = vmatpush3.bf16.msra.mxu0 %v861_v27 }
  0x25   :  { %863 = vmatprep.subr.bf16.mxu0 %v915_v6 }
  0xd6   :  { %v121_v33 = vpop.f32.mrb[0].mxu0 }
  0xd7   :  { %v122_v34 = vadd.f32 %v121_v33, %v46_v32  ;;  %v717_v35 = vpop.f32.mrb[1].mxu0  ;;  %v166_v32 = vld [vmem:[%s1194_s4] sm:$0x7] }
  0xd8   :  { %v186_v33 = vrot.slane %v166_v32, %v1047_v30 }
  0xd9   :  { %v125_v36 = vrot.slane %v122_v34, 4  ;;  %v131_v37 = vmul.f32 %v122_v34, %v122_v34 }
  0xdb   :  { %v126_v38 = vadd.f32 %v125_v36, %v122_v34  ;;  %v132_v39 = vrot.slane %v131_v37, 4 }
  0xdd   :  { %v127_v40 = vrot.slane %v126_v38, 2  ;;  %v133_v41 = vadd.f32 %v132_v39, %v131_v37 }
  0xdf   :  { %v128_v42 = vadd.f32 %v127_v40, %v126_v38  ;;  %v134_v43 = vrot.slane %v133_v41, 2 }
  0xe1   :  { %v129_v44 = vrot.slane %v128_v42, 1  ;;  %v135_v45 = vadd.f32 %v134_v43, %v133_v41 }
  0xe3   :  { %v130_v46 = vadd.f32 %v129_v44, %v128_v42  ;;  %v136_v47 = vrot.slane %v135_v45, 1 }
  0xe5   :  { %v137_v48 = vadd.f32 %v136_v47, %v135_v45  ;;  %v138_v49 = vmul.f32 0.125, %v130_v46 }
  0xe7   :  { %v139_v50 = vmul.f32 0.125, %v137_v48  ;;  %v140_v51 = vmul.f32 %v138_v49, %v138_v49 }
  0xe9   :  { %v141_v52 = vsub.f32 %v139_v50, %v140_v51 }
  0xeb   :  { %v142_v53 = vadd.f32 1e-05, %v141_v52 }
  0xed   :  { %887 = vrsqrt.f32 %v142_v53 }
  0xf7   :  { %v888_v54 = vpop.eup %887 }
  0xf8   :  { %v144_v55 = vmul.f32 %v888_v54, %v41_v31 }
  0xfa   :  { %v145_v57 = vmul.f32 %v144_v55, %v138_v49  ;;  %v153_v59 = vrot.slane %v144_v55, %v1053_v56 }
  0xfc   :  { %v147_v58 = vrot.slane %v145_v57, 7  ;;  %v154_v62 = vmul.f32 %v153_v59, %v122_v34 }
  0xfe   :  { %v149_v61 = vsub.f32 %v41_v31, %v147_v58  ;;  %v864_v31 = vpack.c.bf16 %v314_v29, %v313_v28 }
 0x100   :  { %v158_v63 = vrot.slane %v149_v61, %v1056_v60  ;;  %865 = vmatpush3.bf16.msra.mxu0 %v864_v31 }
 0x101   :  { %878 = vmatprep.subr.bf16.mxu0 %v915_v6 }
 0x102   :  { %v159_v1 = vadd.f32 %v158_v63, %v154_v62 }
 0x104   :  { %v656_v2 = vmul.f32 -1.442695, %v159_v1 }
 0x106   :  { %889 = vpow2.f32 %v656_v2 }
 0x110   :  { %v890_v3 = vpop.eup %889 }
 0x111   :  { %v163_v4 = vadd.f32 1.0, %v890_v3 }
 0x113   :  { %891 = vrcp.f32 %v163_v4 }
 0x11d   :  { %v892_v5 = vpop.eup %891 }
 0x11e   :  { %751 = vmatmul.mubr.f32.vlgmr.msra.gmra.mrb[0].mxu1 %v892_v5 }
 0x11f   :  { %804 = vmatprep.mubr.msk.f32.mxu1 %vm914_vm2, %v913_v0  ;;  %868 = vmatpush3.bf16.msra.mxu1 %v867_v10 }
 0x120   :  { %869 = vmatprep.subr.bf16.mxu1 %v915_v6 }
 0x1f1   :  { %v253_v34 = vpop.f32.mrb[0].mxu1 }
 0x1f2   :  { %v254_v35 = vadd.f32 %v253_v34, %v186_v33  ;;  %v752_v36 = vpop.f32.mrb[1].mxu1 }
 0x1f4   :  { %v257_v37 = vrot.slane %v254_v35, 4  ;;  %v263_v38 = vmul.f32 %v254_v35, %v254_v35 }
 0x1f6   :  { %v258_v39 = vadd.f32 %v257_v37, %v254_v35  ;;  %v264_v40 = vrot.slane %v263_v38, 4 }
 0x1f8   :  { %v259_v41 = vrot.slane %v258_v39, 2  ;;  %v265_v42 = vadd.f32 %v264_v40, %v263_v38 }
 0x1fa   :  { %v260_v43 = vadd.f32 %v259_v41, %v258_v39  ;;  %v266_v44 = vrot.slane %v265_v42, 2 }
 0x1fc   :  { %v261_v45 = vrot.slane %v260_v43, 1  ;;  %v267_v46 = vadd.f32 %v266_v44, %v265_v42 }
 0x1fe   :  { %v262_v47 = vadd.f32 %v261_v45, %v260_v43  ;;  %v268_v48 = vrot.slane %v267_v46, 1 }
 0x200   :  { %v269_v49 = vadd.f32 %v268_v48, %v267_v46  ;;  %v270_v50 = vmul.f32 0.125, %v262_v47 }
 0x202   :  { %v271_v51 = vmul.f32 0.125, %v269_v49  ;;  %v272_v52 = vmul.f32 %v270_v50, %v270_v50 }
 0x204   :  { %v273_v53 = vsub.f32 %v271_v51, %v272_v52 }
 0x206   :  { %v274_v54 = vadd.f32 1e-05, %v273_v53 }
 0x208   :  { %893 = vrsqrt.f32 %v274_v54 }
 0x212   :  { %v894_v55 = vpop.eup %893 }
 0x213   :  { %v276_v57 = vmul.f32 %v894_v55, %v166_v32 }
 0x215   :  { %v277_v58 = vmul.f32 %v276_v57, %v270_v50  ;;  %v285_v61 = vrot.slane %v276_v57, %v1053_v56 }
 0x217   :  { %v279_v59 = vrot.slane %v277_v58, 7  ;;  %v286_v63 = vmul.f32 %v285_v61, %v254_v35  ;;  %v564_v61 = vld [vmem:[%s1197_s9 + $0x8] sm:$0xff] }
 0x219   :  { %v281_v62 = vsub.f32 %v166_v32, %v279_v59  ;;  %v563_v59 = vld [vmem:[%s1197_s9] sm:$0xff] }
 0x21b   :  { %v290_v1 = vrot.slane %v281_v62, %v1056_v60  ;;  %v565_v62 = vld [vmem:[%s1197_s9 + $0x10] sm:$0xff] }
 0x21d   :  { %v291_v2 = vadd.f32 %v290_v1, %v286_v63  ;;  %v879_v63 = vpack.c.bf16 %v564_v61, %v563_v59  ;;  %v566_v1 = vld [vmem:[%s1197_s9 + $0x18] sm:$0xff] }
 0x21f   :  { %v657_v3 = vmul.f32 -1.442695, %v291_v2  ;;  %v882_v2 = vpack.c.bf16 %v566_v1, %v565_v62 }
 0x221   :  { %895 = vpow2.f32 %v657_v3  ;;  %v16_v3 = vstv %s1198_s10 }
 0x222   :  { %17 = vst [vmem:[#allocation2] sm:$0x1] %v16_v3 }
 0x22b   :  { %v896_v4 = vpop.eup %895 }
 0x22c   :  { %v295_v5 = vadd.f32 1.0, %v896_v4  ;;  %v433_v4 = vld [vmem:[%s1199_s8] sm:$0x7] }
 0x22e   :  { %897 = vrcp.f32 %v295_v5  ;;  %v445_v5 = vrot.slane %v433_v4, %v1047_v30 }
 0x238   :  { %v898_v7 = vpop.eup %897 }
 0x239   :  { %786 = vmatmul.mubr.f32.vlgmr.msra.gmra.mrb[2].mxu0 %v898_v7 }
 0x23a   :  { %815 = vmatprep.mubr.msk.f32.mxu0 %vm914_vm2, %v913_v0  ;;  %v437_v0 = vld [vmem:[%s1195_s7 + $0x18] sm:$0xff]  ;;  %880 = vmatpush3.bf16.msra.mxu0 %v879_v63 }
 0x23b   :  { %v870_v12 = vpack.c.bf16 %v437_v0, %v436_v11  ;;  %881 = vmatprep.subr.bf16.mxu0 %v915_v6 }
 0x23d   :  { %871 = vmatpush3.bf16.msra.mxu1 %v870_v12 }
 0x23e   :  { %872 = vmatprep.subr.bf16.mxu1 %v915_v6  ;;  %883 = vmatpush3.bf16.msra.mxu0 %v882_v2 }
 0x241   :  { %874 = vmatpush3.bf16.msra.mxu1 %v873_v15 }
 0x242   :  { %875 = vmatprep.subr.bf16.mxu1 %v915_v6 }
 0x245   :  { %877 = vmatpush3.bf16.msra.mxu1 %v876_v18 }
 0x30c   :  { %v385_v21 = vpop.f32.mrb[2].mxu0 }
 0x30d   :  { %v386_v22 = vadd.f32 %v385_v21, %v318_v20  ;;  %v787_v23 = vpop.f32.mrb[3].mxu0 }
 0x30f   :  { %v390_v24 = vsel %vm389_vm3, %v386_v22, 0.0  ;;  %v397_v25 = vmul.f32 %v386_v22, %v386_v22 }
 0x310   :  { %v391_v26 = vrot.slane %v390_v24, 4 }
 0x311   :  { %v398_v27 = vsel %vm389_vm3, %v397_v25, 0.0 }
 0x312   :  { %v392_v28 = vadd.f32 %v391_v26, %v390_v24  ;;  %v399_v29 = vrot.slane %v398_v27, 4 }
 0x314   :  { %v393_v31 = vrot.slane %v392_v28, 2  ;;  %v400_v32 = vadd.f32 %v399_v29, %v398_v27 }
 0x316   :  { %v394_v33 = vadd.f32 %v393_v31, %v392_v28  ;;  %v401_v34 = vrot.slane %v400_v32, 2 }
 0x318   :  { %v395_v35 = vrot.slane %v394_v33, 1  ;;  %v402_v36 = vadd.f32 %v401_v34, %v400_v32 }
 0x31a   :  { %v396_v37 = vadd.f32 %v395_v35, %v394_v33  ;;  %v403_v38 = vrot.slane %v402_v36, 1 }
 0x31c   :  { %v404_v39 = vadd.f32 %v403_v38, %v402_v36  ;;  %v405_v40 = vmul.f32 0.125, %v396_v37 }
 0x31e   :  { %v406_v41 = vmul.f32 0.125, %v404_v39  ;;  %v407_v42 = vmul.f32 %v405_v40, %v405_v40 }
 0x320   :  { %v408_v43 = vsub.f32 %v406_v41, %v407_v42  ;;  %v661_v41 = vld [vmem:[#allocation2] ss:$0 sm:$0xff] }
 0x322   :  { %v409_v44 = vadd.f32 1e-05, %v408_v43 }
 0x324   :  { %899 = vrsqrt.f32 %v409_v44 }
 0x32e   :  { %v900_v45 = vpop.eup %899 }
 0x32f   :  { %v411_v46 = vmul.f32 %v900_v45, %v298_v19 }
 0x331   :  { %v412_v47 = vmul.f32 %v411_v46, %v405_v40  ;;  %v420_v49 = vrot.slane %v411_v46, %v1053_v56 }
 0x333   :  { %v414_v48 = vrot.slane %v412_v47, 7  ;;  %v421_v51 = vmul.f32 %v420_v49, %v386_v22 }
 0x335   :  { %v416_v50 = vsub.f32 %v298_v19, %v414_v48 }
 0x337   :  { %v425_v52 = vrot.slane %v416_v50, %v1056_v60 }
 0x339   :  { %v426_v53 = vadd.f32 %v425_v52, %v421_v51 }
 0x33b   :  { %v658_v54 = vmul.f32 -1.442695, %v426_v53 }
 0x33d   :  { %901 = vpow2.f32 %v658_v54 }
 0x347   :  { %v902_v55 = vpop.eup %901 }
 0x348   :  { %v430_v57 = vadd.f32 1.0, %v902_v55 }
 0x34a   :  { %903 = vrcp.f32 %v430_v57 }
 0x354   :  { %v904_v58 = vpop.eup %903 }
 0x355   :  { %805 = vmatmul.mubr.msk.f32.vlgmr.msra.gmra.mrb[2].mxu1 %vm389_vm3, %v904_v58 }
 0x428   :  { %v515_v7 = vpop.f32.mrb[2].mxu1 }
 0x429   :  { %v516_v8 = vadd.f32 %v515_v7, %v445_v5  ;;  %v806_v9 = vpop.f32.mrb[3].mxu1 }
 0x42b   :  { %v520_v10 = vsel %vm519_vm4, %v516_v8, 0.0  ;;  %v527_v11 = vmul.f32 %v516_v8, %v516_v8 }
 0x42c   :  { %v521_v6 = vrot.slane %v520_v10, 4 }
 0x42d   :  { %v528_v0 = vsel %vm519_vm4, %v527_v11, 0.0 }
 0x42e   :  { %v522_v12 = vadd.f32 %v521_v6, %v520_v10  ;;  %v529_v13 = vrot.slane %v528_v0, 4 }
 0x430   :  { %v523_v14 = vrot.slane %v522_v12, 2  ;;  %v530_v15 = vadd.f32 %v529_v13, %v528_v0 }
 0x432   :  { %v524_v16 = vadd.f32 %v523_v14, %v522_v12  ;;  %v531_v17 = vrot.slane %v530_v15, 2 }
 0x434   :  { %v525_v18 = vrot.slane %v524_v16, 1  ;;  %v532_v19 = vadd.f32 %v531_v17, %v530_v15 }
 0x436   :  { %v526_v20 = vadd.f32 %v525_v18, %v524_v16  ;;  %v533_v30 = vrot.slane %v532_v19, 1 }
 0x438   :  { %v534_v21 = vadd.f32 %v533_v30, %v532_v19  ;;  %v535_v22 = vmul.f32 0.125, %v526_v20 }
 0x43a   :  { %v536_v23 = vmul.f32 0.125, %v534_v21  ;;  %v537_v24 = vmul.f32 %v535_v22, %v535_v22 }
 0x43c   :  { %v538_v25 = vsub.f32 %v536_v23, %v537_v24 }
 0x43e   :  { %v539_v26 = vadd.f32 1e-05, %v538_v25 }
 0x440   :  { %905 = vrsqrt.f32 %v539_v26 }
 0x44a   :  { %v906_v27 = vpop.eup %905 }
 0x44b   :  { %v541_v28 = vmul.f32 %v906_v27, %v433_v4 }
 0x44d   :  { %v542_v29 = vmul.f32 %v541_v28, %v535_v22  ;;  %v550_v32 = vrot.slane %v541_v28, %v1053_v56 }
 0x44f   :  { %v544_v31 = vrot.slane %v542_v29, 7  ;;  %v551_v34 = vmul.f32 %v550_v32, %v516_v8 }
 0x451   :  { %v546_v33 = vsub.f32 %v433_v4, %v544_v31 }
 0x453   :  { %v555_v35 = vrot.slane %v546_v33, %v1056_v60 }
 0x455   :  { %v556_v36 = vadd.f32 %v555_v35, %v551_v34 }
 0x457   :  { %v660_v37 = vmul.f32 -1.442695, %v556_v36 }
 0x459   :  { %907 = vpow2.f32 %v660_v37 }
 0x463   :  { %v908_v38 = vpop.eup %907 }
 0x464   :  { %v560_v39 = vadd.f32 1.0, %v908_v38 }
 0x466   :  { %909 = vrcp.f32 %v560_v39 }
 0x470   :  { %v910_v40 = vpop.eup %909 }
 0x471   :  { %816 = vmatmul.mubr.msk.f32.vlgmr.msra.gmra.mrb[4].mxu0 %vm519_vm4, %v910_v40 }
 0x544   :  { %v643_v42 = vpop.f32.mrb[4].mxu0 }
 0x545   :  { %v644_v43 = vadd.f32 %v661_v41, %v643_v42  ;;  %v817_v44 = vpop.f32.mrb[5].mxu0 }
 0x547   :  { %911 = vtanh.f32 %v644_v43 }
 0x551   :  { %v912_v56 = vpop.eup %911 }
 0x552   :  { %649 = vst.msk [vmem:[%s1200_s11] sm:$0xff] %vm648_vm5, %v912_v56 }

</bundles_post_ra>
